<compile_context>
chip_gen: v5e
topology: v5e:2x2
jax: 0.10.0
libtpu: 0.0.40
codegen_flags: <defaults>
</compile_context>

<pallas_src>
import jax
import jax.numpy as jnp
from jax import lax
from jax.experimental import pallas as pl
from jax.experimental.pallas import tpu as pltpu

BN_EPS = 1e-5


def make_conv_bn_tanh_kernel(m_valid: int):
    """Kernel factory; m_valid = number of real (non-padded) pixels."""
    inv_m = 1.0 / float(m_valid)

    def kernel(w_ref, p_ref, gamma_ref, beta_ref, o_ref):
        # w_ref:     (Cout, K)      conv weights, K = Cin*KH*KW = 27
        # p_ref:     (K, M_pad)     im2col patches, zero-padded columns beyond m_valid
        # gamma_ref: (Cout, 1)      BN weight
        # beta_ref:  (Cout, 1)      BN bias
        # o_ref:     (Cout, M_pad)  tanh(BN(conv(x)))  (padded cols hold garbage)
        y = jnp.dot(w_ref[...], p_ref[...], preferred_element_type=jnp.float32)

        # One-pass batch statistics over the pixel axis (lane axis).  Padded
        # columns of y are exactly zero (zero patches, no bias), so summing all
        # columns and dividing by m_valid gives the true training-mode stats.
        s = jnp.sum(y, axis=1, keepdims=True)         # (Cout, 1)
        ss = jnp.sum(y * y, axis=1, keepdims=True)    # (Cout, 1)
        mean = s * inv_m
        var = ss * inv_m - mean * mean                # biased variance

        scale = gamma_ref[...] * lax.rsqrt(var + BN_EPS)   # (Cout, 1)
        shift = beta_ref[...] - mean * scale                # (Cout, 1)

        o_ref[...] = jnp.tanh(y * scale + shift)

    return kernel


def model_tanh_forward(x_nchw, conv_w, conv_b, bn_gamma, bn_beta):
    """x_nchw: (N, Cin, H, W); conv_w: (Cout, Cin, 3, 3).

    conv_b is accepted for interface parity but NOT passed to the kernel: the
    conv bias cancels exactly through training-mode BatchNorm ((y+b) - mean(y+b)
    == y - mean(y)), so dropping it saves one elementwise pass and one DMA.
    """
    del conv_b  # algebraic no-op under training-mode BN
    N, Cin, H, W = x_nchw.shape
    Cout = conv_w.shape[0]
    KH = KW = 3
    K = Cin * KH * KW
    M = N * H * W
    M_pad = pl.cdiv(M, 128) * 128  # lane-align the pixel axis

    # --- glue: spatial pad + im2col in (K, M) layout (K=(cin,kh,kw), M=(n,h,w))
    xp = jnp.pad(x_nchw, ((0, 0), (0, 0), (1, 1), (1, 1)))       # (N,Cin,H+2,W+2)
    slabs = [xp[:, :, i:i + H, j:j + W] for i in range(KH) for j in range(KW)]
    patches = jnp.stack(slabs, axis=2)                           # (N,Cin,9,H,W)
    patches = jnp.transpose(patches, (1, 2, 0, 3, 4)).reshape(K, M)
    patches = jnp.pad(patches, ((0, 0), (0, M_pad - M))).astype(jnp.float32)

    # weight (Cout,Cin,KH,KW) -> (Cout, K); K ordering matches patches above.
    w_mat = conv_w.reshape(Cout, K).astype(jnp.float32)
    g_col = bn_gamma.reshape(Cout, 1).astype(jnp.float32)
    b_col = bn_beta.reshape(Cout, 1).astype(jnp.float32)

    # --- fused Pallas kernel: matmul + batchnorm (one-pass stats) + tanh -----
    vmem = pl.BlockSpec(memory_space=pltpu.MemorySpace.VMEM)
    out2d = pl.pallas_call(
        make_conv_bn_tanh_kernel(M),
        out_shape=jax.ShapeDtypeStruct((Cout, M_pad), jnp.float32),
        in_specs=[vmem, vmem, vmem, vmem],
        out_specs=vmem,
    )(w_mat, patches, g_col, b_col)

    # (Cout, M_pad) -> drop pad -> (Cout, N, H, W) -> NCHW
    out = out2d[:, :M].reshape(Cout, N, H, W)
    return jnp.transpose(out, (1, 0, 2, 3))


def reference_forward(x_nchw, conv_w, conv_b, bn_gamma, bn_beta):
    """Pure-JAX reference for verification (keeps the conv bias)."""
    y = lax.conv_general_dilated(
        x_nchw, conv_w, window_strides=(1, 1), padding=((1, 1), (1, 1)),
        dimension_numbers=("NCHW", "OIHW", "NCHW"),
    ) + conv_b[None, :, None, None]
    mean = jnp.mean(y, axis=(0, 2, 3), keepdims=True)
    var = jnp.mean((y - mean) ** 2, axis=(0, 2, 3), keepdims=True)
    z = (y - mean) * lax.rsqrt(var + BN_EPS)
    z = z * bn_gamma[None, :, None, None] + bn_beta[None, :, None, None]
    return jnp.tanh(z)


if __name__ == "__main__":
    key = jax.random.PRNGKey(0)
    kx, kw, kb = jax.random.split(key, 3)

    # Shapes implied by the module / its example input.
    N, Cin, H, W, Cout = 1, 3, 47, 63, 16
    x = jax.random.uniform(kx, (N, Cin, H, W), dtype=jnp.float32)

    # Deterministic parameter init (kaiming-uniform-like bounds, as in torch).
    fan_in = Cin * 3 * 3
    bound = 1.0 / (fan_in ** 0.5)
    conv_w = jax.random.uniform(kw, (Cout, Cin, 3, 3), jnp.float32, -bound, bound)
    conv_b = jax.random.uniform(kb, (Cout,), jnp.float32, -bound, bound)
    bn_gamma = jnp.ones((Cout,), jnp.float32)   # BatchNorm2d default weight
    bn_beta = jnp.zeros((Cout,), jnp.float32)   # BatchNorm2d default bias

    out = model_tanh_forward(x, conv_w, conv_b, bn_gamma, bn_beta)
    out = jax.block_until_ready(out)

    ref = reference_forward(x, conv_w, conv_b, bn_gamma, bn_beta)
    assert out.shape == (N, Cout, H, W)
    assert jnp.allclose(out, ref, atol=1e-4, rtol=1e-4), "mismatch vs reference"

    print("KERNEL_OK")
</pallas_src>

<mosaic_0001>
module attributes {stable_mosaic.version = 11 : i64} {
  func.func @kernel(%arg0: memref<16x27xf32, #tpu.memory_space<vmem>>, %arg1: memref<27x3072xf32, #tpu.memory_space<vmem>>, %arg2: memref<16x1xf32, #tpu.memory_space<vmem>>, %arg3: memref<16x1xf32, #tpu.memory_space<vmem>>, %arg4: memref<16x3072xf32, #tpu.memory_space<vmem>>) attributes {dimension_semantics = [], scalar_prefetch = 0 : i64, scratch_operands = 0 : i64, tpu.core_type = #tpu.core_type<tc>} {
    %c0 = arith.constant 0 : index
    %c0_0 = arith.constant 0 : index
    %0 = vector.load %arg0[%c0, %c0_0] : memref<16x27xf32, #tpu.memory_space<vmem>>, vector<16x27xf32>
    %c0_1 = arith.constant 0 : index
    %c0_2 = arith.constant 0 : index
    %1 = vector.load %arg1[%c0_1, %c0_2] : memref<27x3072xf32, #tpu.memory_space<vmem>>, vector<27x3072xf32>
    %cst = arith.constant dense<0.000000e+00> : vector<16x3072xf32>
    %2 = tpu.matmul %0, %1, %cst {dimension_numbers = #tpu.dot_dimension_numbers<[1], [0], [0], [1], [0, 0, 1, 1], [], []>} : vector<16x27xf32>, vector<27x3072xf32>, vector<16x3072xf32> -> vector<16x3072xf32>
    %cst_3 = arith.constant dense<0.000000e+00> : vector<16xf32>
    %3 = vector.multi_reduction <add>, %2, %cst_3 [1] : vector<16x3072xf32> to vector<16xf32>
    %4 = vector.shape_cast %3 : vector<16xf32> to vector<16x1xf32>
    %5 = arith.mulf %2, %2 : vector<16x3072xf32>
    %cst_4 = arith.constant dense<0.000000e+00> : vector<16xf32>
    %6 = vector.multi_reduction <add>, %5, %cst_4 [1] : vector<16x3072xf32> to vector<16xf32>
    %7 = vector.shape_cast %6 : vector<16xf32> to vector<16x1xf32>
    %cst_5 = arith.constant 3.3772373E-4 : f32
    %8 = vector.broadcast %cst_5 : f32 to vector<16x1xf32>
    %9 = arith.mulf %4, %8 : vector<16x1xf32>
    %cst_6 = arith.constant 3.3772373E-4 : f32
    %10 = vector.broadcast %cst_6 : f32 to vector<16x1xf32>
    %11 = arith.mulf %7, %10 : vector<16x1xf32>
    %12 = arith.mulf %9, %9 : vector<16x1xf32>
    %13 = arith.subf %11, %12 : vector<16x1xf32>
    %c0_7 = arith.constant 0 : index
    %c0_8 = arith.constant 0 : index
    %14 = vector.load %arg2[%c0_7, %c0_8] : memref<16x1xf32, #tpu.memory_space<vmem>>, vector<16x1xf32>
    %cst_9 = arith.constant 9.99999974E-6 : f32
    %15 = vector.broadcast %cst_9 : f32 to vector<16x1xf32>
    %16 = arith.addf %13, %15 : vector<16x1xf32>
    %17 = math.rsqrt %16 : vector<16x1xf32>
    %18 = arith.mulf %14, %17 : vector<16x1xf32>
    %c0_10 = arith.constant 0 : index
    %c0_11 = arith.constant 0 : index
    %19 = vector.load %arg3[%c0_10, %c0_11] : memref<16x1xf32, #tpu.memory_space<vmem>>, vector<16x1xf32>
    %20 = arith.mulf %9, %18 : vector<16x1xf32>
    %21 = arith.subf %19, %20 : vector<16x1xf32>
    %22 = vector.broadcast %18 : vector<16x1xf32> to vector<16x3072xf32>
    %23 = arith.mulf %2, %22 : vector<16x3072xf32>
    %24 = vector.broadcast %21 : vector<16x1xf32> to vector<16x3072xf32>
    %25 = arith.addf %23, %24 : vector<16x3072xf32>
    %26 = math.tanh %25 : vector<16x3072xf32>
    %c0_12 = arith.constant 0 : index
    %c0_13 = arith.constant 0 : index
    %27 = vector.load %arg4[%c0_12, %c0_13] : memref<16x3072xf32, #tpu.memory_space<vmem>>, vector<16x3072xf32>
    tpu.vector_store %arg4[%c0_12, %c0_13], %26 {strides = array<i32>} : memref<16x3072xf32, #tpu.memory_space<vmem>>, vector<16x3072xf32>,
    return
  }
}

</mosaic_0001>

<bundles_post_ra>
// kernel: tpu_custom_call.1
= control target key start
LH: loop header
LB: loop body
LE: loop exit
PB: predicated region body
PF: predicated region fallthrough
CT: control target
= control target key end

     0   :  { %9 = vsyncpa [#allocation3], 0  ;;  %s1991_s0 = inlined_call_operand.vmem [shape: f32[16,27], index: 0, kind: input, shape index: {}]   ;;  %s1992_s1 = inlined_call_operand.hbm [shape: f32[27,3072], index: 1, kind: input, shape index: {}]   ;;  %s1993_s2 = inlined_call_operand.vmem [shape: f32[16,1], index: 2, kind: input, shape index: {}]   ;;  %s1994_s3 = inlined_call_operand.vmem [shape: f32[16,1], index: 3, kind: input, shape index: {}]   ;;  %s1995_s4 = inlined_call_operand.hbm [shape: f32[16,3072], index: 4, kind: output, shape index: {}]  }
   0x1   :  { %10 = vsyncpa [#allocation4], 0  ;;  %s17_s17 = sshll.u32 %s1992_s1, 4  ;;  %s1415_s18 = smov [#allocation2]   ;;  %s18_s17 = int_to_ptr.hbm [resolvable:$true] %s17_s17 }
   0x2   :  { %s19_s19 = sshll.u32 %s1415_s18, 4  ;;  %s1416_s20 = smov 3072   ;;  %s20_s19 = int_to_ptr.vmem [resolvable:$true] %s19_s19 }
   0x3   :  { %s1417_s21 = smov 192  }
   0x4   :  { %25 = dma.hbm_to_vmem [thread:$0]  %s18_s17, 12288, %s20_s19, [#allocation3], %s1416_s20, %s1416_s20, %s1417_s21  }
   0x5   :  { %1411 = dma.done.wait [#allocation3], 12288  }
   0x6   :  { %1412 = vsyncadd [#allocation3], 4294955008  ;;  %vm139_vm0 = vcmask 1042432   ;;  %v108_v0 = vld [vmem:[#allocation2 + $0x240] sm:$0x7]  ;;  %v86_v4 = vld [vmem:[#allocation2 + $0x190] sm:$0xff] }
   0x7   :  { %v110_v1 = vld [vmem:[#allocation2 + $0x250] sm:$0x7]  ;;  %v84_v2 = vld [vmem:[#allocation2 + $0x180] sm:$0xff]  ;;  %1183 = vmatpush.msk.msra.mxu0 %vm139_vm0, %v108_v0  ;;  %v109_v3 = vld [vmem:[#allocation2 + $0x248] sm:$0x7]  ;;  %vm132_vm1 = vcmask 220160  }
   0x8   :  { %1189 = vmatpush.msk.msra.mxu2 %vm139_vm0, %v110_v1  ;;  %v111_v5 = vld [vmem:[#allocation2 + $0x258] sm:$0x7]  ;;  %1186 = vmatpush.msk.msra.mxu1 %vm139_vm0, %v109_v3  ;;  %v60_v6 = vld [vmem:[#allocation2 + $0xc0] sm:$0xff]  ;;  %v85_v7 = vld [vmem:[#allocation2 + $0x188] sm:$0xff]  ;;  %s1170_s8 = sshll.u32 %s1995_s4, 4  ;;  %s1171_s8 = int_to_ptr.hbm [resolvable:$true] %s1170_s8 }
   0x9   :  { %1192 = vmatpush.msk.msra.mxu3 %vm139_vm0, %v111_v5  ;;  %v62_v8 = vld [vmem:[#allocation2 + $0xd0] sm:$0xff]  ;;  %225 = vmatpush.msra.mxu0 %v84_v2  ;;  %v87_v9 = vld [vmem:[#allocation2 + $0x198] sm:$0xff]  ;;  %v61_v10 = vld [vmem:[#allocation2 + $0xc8] sm:$0xff] }
   0xa   :  { %271 = vmatpush.msra.mxu2 %v86_v4  ;;  %248 = vmatpush.msra.mxu1 %v85_v7  ;;  %v36_v11 = vld [vmem:[#allocation2] sm:$0xff]  ;;  %v38_v12 = vld [vmem:[#allocation2 + $0x10] sm:$0xff]  ;;  %v63_v13 = vld [vmem:[#allocation2 + $0xd8] sm:$0xff] }
   0xb   :  { %294 = vmatpush.msra.mxu3 %v87_v9  ;;  %226 = vmatpush.msra.mxu0 %v60_v6  ;;  %v1458_v14 = vld [vmem:[%s1991_s0] sm:$0xff]  ;;  %v114_v15 = vld [vmem:[#allocation2 + $0x270] sm:$0x7]  ;;  %v37_v16 = vld [vmem:[#allocation2 + $0x8] sm:$0xff] }
   0xc   :  { %272 = vmatpush.msra.mxu2 %v62_v8  ;;  %249 = vmatpush.msra.mxu1 %v61_v10  ;;  %v39_v17 = vld [vmem:[#allocation2 + $0x18] sm:$0xff]  ;;  %v112_v18 = vld [vmem:[#allocation2 + $0x260] sm:$0x7]  ;;  %v113_v20 = vld [vmem:[#allocation2 + $0x268] sm:$0x7] }
   0xd   :  { %295 = vmatpush.msra.mxu3 %v63_v13  ;;  %227 = vmatpush.msra.mxu0 %v36_v11  ;;  %v115_v19 = vld [vmem:[#allocation2 + $0x278] sm:$0x7]  ;;  %v90_v21 = vld [vmem:[#allocation2 + $0x1b0] sm:$0xff]  ;;  %v88_v22 = vld [vmem:[#allocation2 + $0x1a0] sm:$0xff] }
   0xe   :  { %273 = vmatpush.msra.mxu2 %v38_v12  ;;  %1184 = vmatmul.msk.f32.vlgmr.msra.gmra.mxu0 %vm132_vm1, %v1458_v14  ;;  %v91_v23 = vld [vmem:[#allocation2 + $0x1b8] sm:$0xff]  ;;  %v89_v24 = vld [vmem:[#allocation2 + $0x1a8] sm:$0xff]  ;;  %v66_v25 = vld [vmem:[#allocation2 + $0xf0] sm:$0xff] }
   0xf   :  { %1190 = vmatmul.msk.f32.vlgmr.msra.gmra.mxu2 %vm132_vm1, %v1458_v14  ;;  %250 = vmatpush.msra.mxu1 %v37_v16  ;;  %v64_v26 = vld [vmem:[#allocation2 + $0xe0] sm:$0xff]  ;;  %v1475_v27 = vld [vmem:[%s1991_s0 + $0x8] sm:$0xff]  ;;  %v67_v28 = vld [vmem:[#allocation2 + $0xf8] sm:$0xff] }
  0x10   :  { %1201 = vmatpush.msk.msrb.mxu2 %vm139_vm0, %v114_v15  ;;  %296 = vmatpush.msra.mxu3 %v39_v17  ;;  %v65_v29 = vld [vmem:[#allocation2 + $0xe8] sm:$0xff]  ;;  %v42_v30 = vld [vmem:[#allocation2 + $0x30] sm:$0xff]  ;;  %v40_v31 = vld [vmem:[#allocation2 + $0x20] sm:$0xff] }
  0x11   :  { %1187 = vmatmul.msk.f32.vlgmr.msra.gmra.mxu1 %vm132_vm1, %v1458_v14  ;;  %1193 = vmatmul.msk.f32.vlgmr.msra.gmra.mxu3 %vm132_vm1, %v1458_v14  ;;  %v43_v32 = vld [vmem:[#allocation2 + $0x38] sm:$0xff]  ;;  %v41_v33 = vld [vmem:[#allocation2 + $0x28] sm:$0xff]  ;;  %v118_v34 = vld [vmem:[#allocation2 + $0x290] sm:$0x7] }
  0x12   :  { %1195 = vmatpush.msk.msrb.mxu0 %vm139_vm0, %v112_v18  ;;  %1204 = vmatpush.msk.msrb.mxu3 %vm139_vm0, %v115_v19  ;;  %v116_v35 = vld [vmem:[#allocation2 + $0x280] sm:$0x7]  ;;  %v119_v36 = vld [vmem:[#allocation2 + $0x298] sm:$0x7]  ;;  %v117_v37 = vld [vmem:[#allocation2 + $0x288] sm:$0x7] }
  0x13   :  { %1198 = vmatpush.msk.msrb.mxu1 %vm139_vm0, %v113_v20  ;;  %363 = vmatpush.msrb.mxu2 %v90_v21  ;;  %v94_v38 = vld [vmem:[#allocation2 + $0x1d0] sm:$0xff]  ;;  %v92_v39 = vld [vmem:[#allocation2 + $0x1c0] sm:$0xff]  ;;  %v95_v40 = vld [vmem:[#allocation2 + $0x1d8] sm:$0xff] }
  0x14   :  { %317 = vmatpush.msrb.mxu0 %v88_v22  ;;  %386 = vmatpush.msrb.mxu3 %v91_v23  ;;  %v93_v41 = vld [vmem:[#allocation2 + $0x1c8] sm:$0xff]  ;;  %v70_v42 = vld [vmem:[#allocation2 + $0x110] sm:$0xff]  ;;  %v68_v43 = vld [vmem:[#allocation2 + $0x100] sm:$0xff] }
  0x15   :  { %340 = vmatpush.msrb.mxu1 %v89_v24  ;;  %364 = vmatpush.msrb.mxu2 %v66_v25  ;;  %v71_v44 = vld [vmem:[#allocation2 + $0x118] sm:$0xff]  ;;  %v69_v45 = vld [vmem:[#allocation2 + $0x108] sm:$0xff]  ;;  %v46_v46 = vld [vmem:[#allocation2 + $0x50] sm:$0xff] }
  0x16   :  { %318 = vmatpush.msrb.mxu0 %v64_v26  ;;  %387 = vmatpush.msrb.mxu3 %v67_v28  ;;  %v44_v47 = vld [vmem:[#allocation2 + $0x40] sm:$0xff]  ;;  %v47_v48 = vld [vmem:[#allocation2 + $0x58] sm:$0xff]  ;;  %v45_v49 = vld [vmem:[#allocation2 + $0x48] sm:$0xff] }
  0x17   :  { %1185 = vmatmul.msk.f32.gmra.mxu0 %vm132_vm1, %v1475_v27  ;;  %1191 = vmatmul.msk.f32.gmra.mxu2 %vm132_vm1, %v1475_v27  ;;  %v122_v50 = vld [vmem:[#allocation2 + $0x2b0] sm:$0x7]  ;;  %v120_v51 = vld [vmem:[#allocation2 + $0x2a0] sm:$0x7]  ;;  %v123_v52 = vld [vmem:[#allocation2 + $0x2b8] sm:$0x7] }
  0x18   :  { %341 = vmatpush.msrb.mxu1 %v65_v29  ;;  %365 = vmatpush.msrb.mxu2 %v42_v30  ;;  %v121_v53 = vld [vmem:[#allocation2 + $0x2a8] sm:$0x7]  ;;  %v98_v54 = vld [vmem:[#allocation2 + $0x1f0] sm:$0xff]  ;;  %v96_v55 = vld [vmem:[#allocation2 + $0x1e0] sm:$0xff] }
  0x19   :  { %1188 = vmatmul.msk.f32.gmra.mxu1 %vm132_vm1, %v1475_v27  ;;  %1194 = vmatmul.msk.f32.gmra.mxu3 %vm132_vm1, %v1475_v27  ;;  %v99_v56 = vld [vmem:[#allocation2 + $0x1f8] sm:$0xff]  ;;  %v97_v57 = vld [vmem:[#allocation2 + $0x1e8] sm:$0xff]  ;;  %v74_v58 = vld [vmem:[#allocation2 + $0x130] sm:$0xff] }
  0x1a   :  { %319 = vmatpush.msrb.mxu0 %v40_v31  ;;  %388 = vmatpush.msrb.mxu3 %v43_v32  ;;  %v72_v59 = vld [vmem:[#allocation2 + $0x120] sm:$0xff]  ;;  %v75_v60 = vld [vmem:[#allocation2 + $0x138] sm:$0xff]  ;;  %v73_v61 = vld [vmem:[#allocation2 + $0x128] sm:$0xff] }
  0x1b   :  { %342 = vmatpush.msrb.mxu1 %v41_v33  ;;  %1213 = vmatpush.msk.msra.mxu2 %vm139_vm0, %v118_v34  ;;  %v50_v62 = vld [vmem:[#allocation2 + $0x70] sm:$0xff]  ;;  %v48_v63 = vld [vmem:[#allocation2 + $0x60] sm:$0xff]  ;;  %v51_v0 = vld [vmem:[#allocation2 + $0x78] sm:$0xff] }
  0x1c   :  { %1207 = vmatpush.msk.msra.mxu0 %vm139_vm0, %v116_v35  ;;  %1216 = vmatpush.msk.msra.mxu3 %vm139_vm0, %v119_v36  ;;  %v49_v1 = vld [vmem:[#allocation2 + $0x68] sm:$0xff]  ;;  %v126_v2 = vld [vmem:[#allocation2 + $0x2d0] sm:$0x7]  ;;  %v124_v3 = vld [vmem:[#allocation2 + $0x2c0] sm:$0x7] }
  0x1d   :  { %1210 = vmatpush.msk.msra.mxu1 %vm139_vm0, %v117_v37  ;;  %455 = vmatpush.msra.mxu2 %v94_v38  ;;  %v127_v4 = vld [vmem:[#allocation2 + $0x2d8] sm:$0x7]  ;;  %v125_v5 = vld [vmem:[#allocation2 + $0x2c8] sm:$0x7]  ;;  %v102_v6 = vld [vmem:[#allocation2 + $0x210] sm:$0xff] }
  0x1e   :  { %409 = vmatpush.msra.mxu0 %v92_v39  ;;  %478 = vmatpush.msra.mxu3 %v95_v40  ;;  %v100_v7 = vld [vmem:[#allocation2 + $0x200] sm:$0xff]  ;;  %v103_v8 = vld [vmem:[#allocation2 + $0x218] sm:$0xff]  ;;  %v101_v9 = vld [vmem:[#allocation2 + $0x208] sm:$0xff] }
  0x1f   :  { %1196 = vmatmul.msk.f32.vlgmr.msrb.gmra.mxu0 %vm132_vm1, %v1458_v14  ;;  %1202 = vmatmul.msk.f32.vlgmr.msrb.gmra.mxu2 %vm132_vm1, %v1458_v14  ;;  %v78_v10 = vld [vmem:[#allocation2 + $0x150] sm:$0xff]  ;;  %v76_v11 = vld [vmem:[#allocation2 + $0x140] sm:$0xff]  ;;  %v79_v12 = vld [vmem:[#allocation2 + $0x158] sm:$0xff] }
  0x20   :  { %432 = vmatpush.msra.mxu1 %v93_v41  ;;  %456 = vmatpush.msra.mxu2 %v70_v42  ;;  %v77_v13 = vld [vmem:[#allocation2 + $0x148] sm:$0xff]  ;;  %v54_v15 = vld [vmem:[#allocation2 + $0x90] sm:$0xff]  ;;  %v52_v16 = vld [vmem:[#allocation2 + $0x80] sm:$0xff] }
  0x21   :  { %1199 = vmatmul.msk.f32.vlgmr.msrb.gmra.mxu1 %vm132_vm1, %v1458_v14  ;;  %1205 = vmatmul.msk.f32.vlgmr.msrb.gmra.mxu3 %vm132_vm1, %v1458_v14  ;;  %v55_v17 = vld [vmem:[#allocation2 + $0x98] sm:$0xff]  ;;  %v53_v18 = vld [vmem:[#allocation2 + $0x88] sm:$0xff]  ;;  %v130_v19 = vld [vmem:[#allocation2 + $0x2f0] sm:$0x7] }
  0x22   :  { %410 = vmatpush.msra.mxu0 %v68_v43  ;;  %479 = vmatpush.msra.mxu3 %v71_v44  ;;  %v128_v20 = vld [vmem:[#allocation2 + $0x2e0] sm:$0x7]  ;;  %v129_v21 = vld [vmem:[#allocation2 + $0x2e8] sm:$0x7]  ;;  %v131_v22 = vld [vmem:[#allocation2 + $0x2f8] sm:$0x7] }
  0x23   :  { %433 = vmatpush.msra.mxu1 %v69_v45  ;;  %457 = vmatpush.msra.mxu2 %v46_v46  ;;  %v106_v23 = vld [vmem:[#allocation2 + $0x230] sm:$0xff]  ;;  %v104_v24 = vld [vmem:[#allocation2 + $0x220] sm:$0xff]  ;;  %v105_v25 = vld [vmem:[#allocation2 + $0x228] sm:$0xff] }
  0x24   :  { %411 = vmatpush.msra.mxu0 %v44_v47  ;;  %480 = vmatpush.msra.mxu3 %v47_v48  ;;  %v107_v26 = vld [vmem:[#allocation2 + $0x238] sm:$0xff]  ;;  %v82_v28 = vld [vmem:[#allocation2 + $0x170] sm:$0xff]  ;;  %v80_v29 = vld [vmem:[#allocation2 + $0x160] sm:$0xff] }
  0x25   :  { %434 = vmatpush.msra.mxu1 %v45_v49  ;;  %1225 = vmatpush.msk.msrb.mxu2 %vm139_vm0, %v122_v50  ;;  %v81_v30 = vld [vmem:[#allocation2 + $0x168] sm:$0xff]  ;;  %v83_v31 = vld [vmem:[#allocation2 + $0x178] sm:$0xff]  ;;  %v58_v32 = vld [vmem:[#allocation2 + $0xb0] sm:$0xff] }
  0x26   :  { %1219 = vmatpush.msk.msrb.mxu0 %vm139_vm0, %v120_v51  ;;  %1228 = vmatpush.msk.msrb.mxu3 %vm139_vm0, %v123_v52  ;;  %v56_v33 = vld [vmem:[#allocation2 + $0xa0] sm:$0xff]  ;;  %v57_v34 = vld [vmem:[#allocation2 + $0xa8] sm:$0xff]  ;;  %v59_v35 = vld [vmem:[#allocation2 + $0xb8] sm:$0xff] }
  0x27   :  { %1197 = vmatmul.msk.f32.gmra.mxu0 %vm132_vm1, %v1475_v27  ;;  %1203 = vmatmul.msk.f32.gmra.mxu2 %vm132_vm1, %v1475_v27 }
  0x28   :  { %1222 = vmatpush.msk.msrb.mxu1 %vm139_vm0, %v121_v53  ;;  %547 = vmatpush.msrb.mxu2 %v98_v54 }
  0x29   :  { %1200 = vmatmul.msk.f32.gmra.mxu1 %vm132_vm1, %v1475_v27  ;;  %1206 = vmatmul.msk.f32.gmra.mxu3 %vm132_vm1, %v1475_v27 }
  0x2a   :  { %501 = vmatpush.msrb.mxu0 %v96_v55  ;;  %570 = vmatpush.msrb.mxu3 %v99_v56 }
  0x2b   :  { %524 = vmatpush.msrb.mxu1 %v97_v57  ;;  %548 = vmatpush.msrb.mxu2 %v74_v58 }
  0x2c   :  { %502 = vmatpush.msrb.mxu0 %v72_v59  ;;  %571 = vmatpush.msrb.mxu3 %v75_v60 }
  0x2d   :  { %525 = vmatpush.msrb.mxu1 %v73_v61  ;;  %549 = vmatpush.msrb.mxu2 %v50_v62 }
  0x2e   :  { %503 = vmatpush.msrb.mxu0 %v48_v63  ;;  %572 = vmatpush.msrb.mxu3 %v51_v0 }
  0x2f   :  { %1208 = vmatmul.msk.f32.vlgmr.msra.gmra.mxu0 %vm132_vm1, %v1458_v14  ;;  %1214 = vmatmul.msk.f32.vlgmr.msra.gmra.mxu2 %vm132_vm1, %v1458_v14 }
  0x30   :  { %526 = vmatpush.msrb.mxu1 %v49_v1  ;;  %1237 = vmatpush.msk.msra.mxu2 %vm139_vm0, %v126_v2 }
  0x31   :  { %1211 = vmatmul.msk.f32.vlgmr.msra.gmra.mxu1 %vm132_vm1, %v1458_v14  ;;  %1217 = vmatmul.msk.f32.vlgmr.msra.gmra.mxu3 %vm132_vm1, %v1458_v14 }
  0x32   :  { %1231 = vmatpush.msk.msra.mxu0 %vm139_vm0, %v124_v3  ;;  %1240 = vmatpush.msk.msra.mxu3 %vm139_vm0, %v127_v4 }
  0x33   :  { %1234 = vmatpush.msk.msra.mxu1 %vm139_vm0, %v125_v5  ;;  %639 = vmatpush.msra.mxu2 %v102_v6 }
  0x34   :  { %593 = vmatpush.msra.mxu0 %v100_v7  ;;  %662 = vmatpush.msra.mxu3 %v103_v8 }
  0x35   :  { %616 = vmatpush.msra.mxu1 %v101_v9  ;;  %640 = vmatpush.msra.mxu2 %v78_v10 }
  0x36   :  { %594 = vmatpush.msra.mxu0 %v76_v11  ;;  %663 = vmatpush.msra.mxu3 %v79_v12 }
  0x37   :  { %1209 = vmatmul.msk.f32.gmra.mxu0 %vm132_vm1, %v1475_v27  ;;  %1215 = vmatmul.msk.f32.gmra.mxu2 %vm132_vm1, %v1475_v27 }
  0x38   :  { %617 = vmatpush.msra.mxu1 %v77_v13  ;;  %641 = vmatpush.msra.mxu2 %v54_v15 }
  0x39   :  { %1212 = vmatmul.msk.f32.gmra.mxu1 %vm132_vm1, %v1475_v27  ;;  %1218 = vmatmul.msk.f32.gmra.mxu3 %vm132_vm1, %v1475_v27 }
  0x3a   :  { %595 = vmatpush.msra.mxu0 %v52_v16  ;;  %664 = vmatpush.msra.mxu3 %v55_v17 }
  0x3b   :  { %618 = vmatpush.msra.mxu1 %v53_v18 }
  0x3f   :  { %1220 = vmatmul.msk.f32.vlgmr.msrb.gmra.mxu0 %vm132_vm1, %v1458_v14  ;;  %1226 = vmatmul.msk.f32.vlgmr.msrb.gmra.mxu2 %vm132_vm1, %v1458_v14 }
  0x40   :  { %1249 = vmatpush.msk.msrb.mxu2 %vm139_vm0, %v130_v19  ;;  %1243 = vmatpush.msk.msrb.mxu0 %vm139_vm0, %v128_v20 }
  0x41   :  { %1223 = vmatmul.msk.f32.vlgmr.msrb.gmra.mxu1 %vm132_vm1, %v1458_v14  ;;  %1229 = vmatmul.msk.f32.vlgmr.msrb.gmra.mxu3 %vm132_vm1, %v1458_v14 }
  0x42   :  { %1246 = vmatpush.msk.msrb.mxu1 %vm139_vm0, %v129_v21  ;;  %1252 = vmatpush.msk.msrb.mxu3 %vm139_vm0, %v131_v22 }
  0x43   :  { %731 = vmatpush.msrb.mxu2 %v106_v23  ;;  %685 = vmatpush.msrb.mxu0 %v104_v24 }
  0x44   :  { %708 = vmatpush.msrb.mxu1 %v105_v25  ;;  %754 = vmatpush.msrb.mxu3 %v107_v26 }
  0x45   :  { %732 = vmatpush.msrb.mxu2 %v82_v28  ;;  %686 = vmatpush.msrb.mxu0 %v80_v29 }
  0x46   :  { %709 = vmatpush.msrb.mxu1 %v81_v30  ;;  %755 = vmatpush.msrb.mxu3 %v83_v31 }
  0x47   :  { %1221 = vmatmul.msk.f32.gmra.mxu0 %vm132_vm1, %v1475_v27  ;;  %1227 = vmatmul.msk.f32.gmra.mxu2 %vm132_vm1, %v1475_v27 }
  0x48   :  { %733 = vmatpush.msrb.mxu2 %v58_v32  ;;  %687 = vmatpush.msrb.mxu0 %v56_v33 }
  0x49   :  { %1224 = vmatmul.msk.f32.gmra.mxu1 %vm132_vm1, %v1475_v27  ;;  %1230 = vmatmul.msk.f32.gmra.mxu3 %vm132_vm1, %v1475_v27 }
  0x4a   :  { %710 = vmatpush.msrb.mxu1 %v57_v34  ;;  %756 = vmatpush.msrb.mxu3 %v59_v35 }
  0x4f   :  { %1232 = vmatmul.msk.f32.vlgmr.msra.gmra.mxu0 %vm132_vm1, %v1458_v14  ;;  %1238 = vmatmul.msk.f32.vlgmr.msra.gmra.mxu2 %vm132_vm1, %v1458_v14 }
  0x51   :  { %1235 = vmatmul.msk.f32.vlgmr.msra.gmra.mxu1 %vm132_vm1, %v1458_v14  ;;  %1241 = vmatmul.msk.f32.vlgmr.msra.gmra.mxu3 %vm132_vm1, %v1458_v14 }
  0x57   :  { %1233 = vmatmul.msk.f32.gmra.mxu0 %vm132_vm1, %v1475_v27  ;;  %1239 = vmatmul.msk.f32.gmra.mxu2 %vm132_vm1, %v1475_v27 }
  0x59   :  { %1236 = vmatmul.msk.f32.gmra.mxu1 %vm132_vm1, %v1475_v27  ;;  %1242 = vmatmul.msk.f32.gmra.mxu3 %vm132_vm1, %v1475_v27 }
  0x5f   :  { %1244 = vmatmul.msk.f32.vlgmr.msrb.gmra.mxu0 %vm132_vm1, %v1458_v14  ;;  %1250 = vmatmul.msk.f32.vlgmr.msrb.gmra.mxu2 %vm132_vm1, %v1458_v14 }
  0x61   :  { %1247 = vmatmul.msk.f32.vlgmr.msrb.gmra.mxu1 %vm132_vm1, %v1458_v14  ;;  %1253 = vmatmul.msk.f32.vlgmr.msrb.gmra.mxu3 %vm132_vm1, %v1458_v14 }
  0x67   :  { %1245 = vmatmul.msk.f32.gmra.mxu0 %vm132_vm1, %v1475_v27  ;;  %1251 = vmatmul.msk.f32.gmra.mxu2 %vm132_vm1, %v1475_v27 }
  0x69   :  { %1248 = vmatmul.msk.f32.gmra.mxu1 %vm132_vm1, %v1475_v27  ;;  %1254 = vmatmul.msk.f32.gmra.mxu3 %vm132_vm1, %v1475_v27 }
  0x8b   :  { %v1581_v36 = vpop.f32.mrf.mxu0 }
  0x8c   :  { %v814_v45 = vmul.f32 %v1581_v36, %v1581_v36 }
  0x8e   :  { %v1583_v37 = vpop.f32.mrf.mxu1 }
  0x8f   :  { %v815_v46 = vmul.f32 %v1583_v37, %v1583_v37  ;;  %v764_v48 = vadd.f32 %v1583_v37, %v1581_v36 }
  0x91   :  { %v862_v52 = vadd.f32 %v815_v46, %v814_v45 }
  0x92   :  { %v1585_v38 = vpop.f32.mrf.mxu2 }
  0x93   :  { %v816_v49 = vmul.f32 %v1585_v38, %v1585_v38  ;;  %v765_v53 = vadd.f32 %v764_v48, %v1585_v38 }
  0x94   :  { %v1587_v39 = vpop.f32.mrf.mxu0  ;;  %v1589_v14 = vpop.f32.mrf.mxu3 }
  0x95   :  { %v863_v54 = vadd.f32 %v862_v52, %v816_v49  ;;  %v817_v55 = vmul.f32 %v1589_v14, %v1589_v14  ;;  %v838_v57 = vmul.f32 %v1587_v39, %v1587_v39  ;;  %v766_v58 = vadd.f32 %v765_v53, %v1589_v14 }
  0x96   :  { %v1591_v40 = vpop.f32.mrf.mxu1 }
  0x97   :  { %v839_v59 = vmul.f32 %v1591_v40, %v1591_v40  ;;  %v789_v61 = vadd.f32 %v1591_v40, %v1587_v39  ;;  %v864_v63 = vadd.f32 %v863_v54, %v817_v55 }
  0x99   :  { %v887_v5 = vadd.f32 %v839_v59, %v838_v57 }
  0x9a   :  { %v1593_v41 = vpop.f32.mrf.mxu2 }
  0x9b   :  { %v840_v0 = vmul.f32 %v1593_v41, %v1593_v41  ;;  %v790_v3 = vadd.f32 %v789_v61, %v1593_v41 }
  0x9c   :  { %v1595_v42 = vpop.f32.mrf.mxu0  ;;  %v1597_v43 = vpop.f32.mrf.mxu3 }
  0x9d   :  { %v818_v60 = vmul.f32 %v1595_v42, %v1595_v42  ;;  %v767_v1 = vadd.f32 %v766_v58, %v1595_v42  ;;  %v888_v8 = vadd.f32 %v887_v5, %v840_v0  ;;  %v841_v9 = vmul.f32 %v1597_v43, %v1597_v43 }
  0x9e   :  { %v1599_v44 = vpop.f32.mrf.mxu1  ;;  %v791_v12 = vadd.f32 %v790_v3, %v1597_v43 }
  0x9f   :  { %v865_v6 = vadd.f32 %v864_v63, %v818_v60  ;;  %v819_v7 = vmul.f32 %v1599_v44, %v1599_v44  ;;  %v768_v10 = vadd.f32 %v767_v1, %v1599_v44  ;;  %v889_v20 = vadd.f32 %v888_v8, %v841_v9 }
  0xa1   :  { %v866_v15 = vadd.f32 %v865_v6, %v819_v7 }
  0xa2   :  { %v1601_v27 = vpop.f32.mrf.mxu2 }
  0xa3   :  { %v820_v11 = vmul.f32 %v1601_v27, %v1601_v27  ;;  %v769_v16 = vadd.f32 %v768_v10, %v1601_v27 }
  0xa4   :  { %v1607_v47 = vpop.f32.mrf.mxu0  ;;  %v1613_v50 = vpop.f32.mrf.mxu3 }
  0xa5   :  { %v842_v17 = vmul.f32 %v1607_v47, %v1607_v47  ;;  %v792_v18 = vadd.f32 %v791_v12, %v1607_v47  ;;  %v867_v21 = vadd.f32 %v866_v15, %v820_v11  ;;  %v821_v22 = vmul.f32 %v1613_v50, %v1613_v50 }
  0xa6   :  { %v1615_v51 = vpop.f32.mrf.mxu1  ;;  %v770_v26 = vadd.f32 %v769_v16, %v1613_v50 }
  0xa7   :  { %v890_v25 = vadd.f32 %v889_v20, %v842_v17  ;;  %v843_v28 = vmul.f32 %v1615_v51, %v1615_v51  ;;  %v793_v30 = vadd.f32 %v792_v18, %v1615_v51  ;;  %v868_v31 = vadd.f32 %v867_v21, %v821_v22 }
  0xa9   :  { %v891_v45 = vadd.f32 %v890_v25, %v843_v28 }
  0xaa   :  { %v1620_v56 = vpop.f32.mrf.mxu2 }
  0xab   :  { %v844_v32 = vmul.f32 %v1620_v56, %v1620_v56  ;;  %v794_v34 = vadd.f32 %v793_v30, %v1620_v56 }
  0xac   :  { %v1631_v62 = vpop.f32.mrf.mxu0  ;;  %v1636_v2 = vpop.f32.mrf.mxu3 }
  0xad   :  { %v822_v29 = vmul.f32 %v1631_v62, %v1631_v62  ;;  %v771_v33 = vadd.f32 %v770_v26, %v1631_v62  ;;  %v892_v52 = vadd.f32 %v891_v45, %v844_v32  ;;  %v845_v53 = vmul.f32 %v1636_v2, %v1636_v2 }
  0xae   :  { %v1639_v4 = vpop.f32.mrf.mxu1  ;;  %v795_v58 = vadd.f32 %v794_v34, %v1636_v2 }
  0xaf   :  { %v869_v46 = vadd.f32 %v868_v31, %v822_v29  ;;  %v823_v48 = vmul.f32 %v1639_v4, %v1639_v4  ;;  %v772_v54 = vadd.f32 %v771_v33, %v1639_v4  ;;  %v893_v1 = vadd.f32 %v892_v52, %v845_v53 }
  0xb1   :  { %v870_v60 = vadd.f32 %v869_v46, %v823_v48 }
  0xb2   :  { %v1649_v13 = vpop.f32.mrf.mxu2 }
  0xb3   :  { %v824_v55 = vmul.f32 %v1649_v13, %v1649_v13  ;;  %v773_v61 = vadd.f32 %v772_v54, %v1649_v13 }
  0xb4   :  { %v1655_v19 = vpop.f32.mrf.mxu0  ;;  %v1659_v23 = vpop.f32.mrf.mxu3 }
  0xb5   :  { %v846_v63 = vmul.f32 %v1655_v19, %v1655_v19  ;;  %v796_v0 = vadd.f32 %v795_v58, %v1655_v19  ;;  %v871_v3 = vadd.f32 %v870_v60, %v824_v55  ;;  %v825_v5 = vmul.f32 %v1659_v23, %v1659_v23 }
  0xb6   :  { %v1661_v24 = vpop.f32.mrf.mxu1  ;;  %v774_v8 = vadd.f32 %v773_v61, %v1659_v23 }
  0xb7   :  { %v894_v7 = vadd.f32 %v893_v1, %v846_v63  ;;  %v847_v9 = vmul.f32 %v1661_v24, %v1661_v24  ;;  %v797_v11 = vadd.f32 %v796_v0, %v1661_v24  ;;  %v872_v15 = vadd.f32 %v871_v3, %v825_v5 }
  0xb9   :  { %v895_v22 = vadd.f32 %v894_v7, %v847_v9 }
  0xba   :  { %v1673_v35 = vpop.f32.mrf.mxu2 }
  0xbb   :  { %v848_v16 = vmul.f32 %v1673_v35, %v1673_v35  ;;  %v798_v20 = vadd.f32 %v797_v11, %v1673_v35 }
  0xbc   :  { %v1677_v49 = vpop.f32.mrf.mxu0  ;;  %v1684_v57 = vpop.f32.mrf.mxu3 }
  0xbd   :  { %v826_v10 = vmul.f32 %v1677_v49, %v1677_v49  ;;  %v775_v17 = vadd.f32 %v774_v8, %v1677_v49  ;;  %v896_v28 = vadd.f32 %v895_v22, %v848_v16  ;;  %v849_v29 = vmul.f32 %v1684_v57, %v1684_v57 }
  0xbe   :  { %v1687_v59 = vpop.f32.mrf.mxu1  ;;  %v799_v32 = vadd.f32 %v798_v20, %v1684_v57 }
  0xbf   :  { %v873_v25 = vadd.f32 %v872_v15, %v826_v10  ;;  %v827_v26 = vmul.f32 %v1687_v59, %v1687_v59  ;;  %v776_v30 = vadd.f32 %v775_v17, %v1687_v59  ;;  %v897_v53 = vadd.f32 %v896_v28, %v849_v29 }
  0xc1   :  { %v874_v34 = vadd.f32 %v873_v25, %v827_v26 }
  0xc2   :  { %v1695_v6 = vpop.f32.mrf.mxu2 }
  0xc3   :  { %v828_v31 = vmul.f32 %v1695_v6, %v1695_v6  ;;  %v777_v45 = vadd.f32 %v776_v30, %v1695_v6 }
  0xc4   :  { %v1703_v12 = vpop.f32.mrf.mxu0  ;;  %v1708_v18 = vpop.f32.mrf.mxu3 }
  0xc5   :  { %v850_v46 = vmul.f32 %v1703_v12, %v1703_v12  ;;  %v800_v48 = vadd.f32 %v799_v32, %v1703_v12  ;;  %v875_v54 = vadd.f32 %v874_v34, %v828_v31  ;;  %v829_v55 = vmul.f32 %v1708_v18, %v1708_v18 }
  0xc6   :  { %v1711_v21 = vpop.f32.mrf.mxu1  ;;  %v778_v63 = vadd.f32 %v777_v45, %v1708_v18 }
  0xc7   :  { %v898_v61 = vadd.f32 %v897_v53, %v850_v46  ;;  %v851_v0 = vmul.f32 %v1711_v21, %v1711_v21  ;;  %v801_v3 = vadd.f32 %v800_v48, %v1711_v21  ;;  %v876_v5 = vadd.f32 %v875_v54, %v829_v55 }
  0xc9   :  { %v899_v11 = vadd.f32 %v898_v61, %v851_v0 }
  0xca   :  { %v1721_v33 = vpop.f32.mrf.mxu2 }
  0xcb   :  { %v852_v7 = vmul.f32 %v1721_v33, %v1721_v33  ;;  %v802_v9 = vadd.f32 %v801_v3, %v1721_v33 }
  0xcc   :  { %v1727_v52 = vpop.f32.mrf.mxu0  ;;  %v1731_v58 = vpop.f32.mrf.mxu3 }
  0xcd   :  { %v830_v1 = vmul.f32 %v1727_v52, %v1727_v52  ;;  %v779_v8 = vadd.f32 %v778_v63, %v1727_v52  ;;  %v900_v20 = vadd.f32 %v899_v11, %v852_v7  ;;  %v853_v22 = vmul.f32 %v1731_v58, %v1731_v58 }
  0xce   :  { %v1733_v60 = vpop.f32.mrf.mxu1  ;;  %v803_v29 = vadd.f32 %v802_v9, %v1731_v58 }
  0xcf   :  { %v877_v15 = vadd.f32 %v876_v5, %v830_v1  ;;  %v831_v16 = vmul.f32 %v1733_v60, %v1733_v60  ;;  %v780_v25 = vadd.f32 %v779_v8, %v1733_v60  ;;  %v901_v46 = vadd.f32 %v900_v20, %v853_v22 }
  0xd1   :  { %v878_v31 = vadd.f32 %v877_v15, %v831_v16 }
  0xd2   :  { %v1745_v10 = vpop.f32.mrf.mxu2 }
  0xd3   :  { %v832_v26 = vmul.f32 %v1745_v10, %v1745_v10  ;;  %v781_v32 = vadd.f32 %v780_v25, %v1745_v10 }
  0xd4   :  { %v1749_v17 = vpop.f32.mrf.mxu0  ;;  %v1756_v28 = vpop.f32.mrf.mxu3 }
  0xd5   :  { %v854_v34 = vmul.f32 %v1749_v17, %v1749_v17  ;;  %v804_v45 = vadd.f32 %v803_v29, %v1749_v17  ;;  %v879_v48 = vadd.f32 %v878_v31, %v832_v26  ;;  %v833_v53 = vmul.f32 %v1756_v28, %v1756_v28 }
  0xd6   :  { %v1759_v30 = vpop.f32.mrf.mxu1  ;;  %v782_v61 = vadd.f32 %v781_v32, %v1756_v28 }
  0xd7   :  { %v902_v55 = vadd.f32 %v901_v46, %v854_v34  ;;  %v855_v63 = vmul.f32 %v1759_v30, %v1759_v30  ;;  %v805_v0 = vadd.f32 %v804_v45, %v1759_v30  ;;  %v880_v3 = vadd.f32 %v879_v48, %v833_v53 }
  0xd9   :  { %v903_v15 = vadd.f32 %v902_v55, %v855_v63 }
  0xda   :  { %v1767_v54 = vpop.f32.mrf.mxu2 }
  0xdb   :  { %v856_v5 = vmul.f32 %v1767_v54, %v1767_v54  ;;  %v806_v16 = vadd.f32 %v805_v0, %v1767_v54 }
  0xdc   :  { %v1773_v1 = vpop.f32.mrf.mxu0  ;;  %v1777_v7 = vpop.f32.mrf.mxu3 }
  0xdd   :  { %v783_v8 = vadd.f32 %v782_v61, %v1773_v1  ;;  %v834_v9 = vmul.f32 %v1773_v1, %v1773_v1  ;;  %v904_v25 = vadd.f32 %v903_v15, %v856_v5  ;;  %v857_v26 = vmul.f32 %v1777_v7, %v1777_v7 }
  0xde   :  { %v1782_v11 = vpop.f32.mrf.mxu1  ;;  %v807_v32 = vadd.f32 %v806_v16, %v1777_v7 }
  0xdf   :  { %v881_v20 = vadd.f32 %v880_v3, %v834_v9  ;;  %v835_v22 = vmul.f32 %v1782_v11, %v1782_v11  ;;  %v784_v29 = vadd.f32 %v783_v8, %v1782_v11  ;;  %v905_v53 = vadd.f32 %v904_v25, %v857_v26 }
  0xe1   :  { %v882_v46 = vadd.f32 %v881_v20, %v835_v22 }
  0xe2   :  { %v1790_v31 = vpop.f32.mrf.mxu2 }
  0xe3   :  { %v836_v34 = vmul.f32 %v1790_v31, %v1790_v31  ;;  %v785_v45 = vadd.f32 %v784_v29, %v1790_v31 }
  0xe4   :  { %v1796_v48 = vpop.f32.mrf.mxu0  ;;  %v1801_v63 = vpop.f32.mrf.mxu3 }
  0xe5   :  { %2000 = vst [vmem:[#allocation8_spill] sm:$0xff] %v1796_v48  ;;  %v808_v55 = vadd.f32 %v807_v32, %v1796_v48  ;;  %v858_v61 = vmul.f32 %v1796_v48, %v1796_v48  ;;  %v883_v0 = vadd.f32 %v882_v46, %v836_v34  ;;  %v786_v5 = vadd.f32 %v785_v45, %v1801_v63 }
  0xe6   :  { %v1803_v3 = vpop.f32.mrf.mxu1  ;;  %v837_v8 = vmul.f32 %v1801_v63, %v1801_v63 }
  0xe7   :  { %2001 = vst [vmem:[#allocation9_spill] sm:$0xff] %v1803_v3  ;;  %v906_v9 = vadd.f32 %v905_v53, %v858_v61  ;;  %v859_v15 = vmul.f32 %v1803_v3, %v1803_v3  ;;  %787 = vadd.xlane.f32.xlu0 %v786_v5  ;;  %v809_v20 = vadd.f32 %v808_v55, %v1803_v3  ;;  %v1418_v55 = vmov 0  }
  0xe8   :  { %v884_v16 = vadd.f32 %v883_v0, %v837_v8  ;;  %1260 = vset.pattern.permute.xlu2 %v1418_v55  ;;  %1261 = vset.pattern.permute.xlu0 %v1418_v55 }
  0xe9   :  { %v907_v25 = vadd.f32 %v906_v9, %v859_v15  ;;  %1262 = vset.pattern.permute.xlu1 %v1418_v55 }
  0xea   :  { %885 = vadd.xlane.f32.xlu1 %v884_v16  ;;  %v1811_v22 = vpop.f32.mrf.mxu2 }
  0xeb   :  { %2002 = vst [vmem:[#allocation10_spill] sm:$0xff] %v1811_v22  ;;  %v810_v26 = vadd.f32 %v809_v20, %v1811_v22  ;;  %v860_v29 = vmul.f32 %v1811_v22, %v1811_v22 }
  0xec   :  { %v1816_v32 = vpop.f32.mrf.mxu3 }
  0xed   :  { %2003 = vst [vmem:[#allocation11_spill] sm:$0xff] %v1816_v32  ;;  %v908_v34 = vadd.f32 %v907_v25, %v860_v29  ;;  %v861_v45 = vmul.f32 %v1816_v32, %v1816_v32  ;;  %v811_v46 = vadd.f32 %v810_v26, %v1816_v32 }
  0xef   :  { %812 = vadd.xlane.f32.xlu0 %v811_v46  ;;  %v909_v53 = vadd.f32 %v908_v34, %v861_v45 }
  0xf2   :  { %910 = vadd.xlane.f32.xlu1 %v909_v53 }
 0x15a   :  { %v788_v61 = vpop.xlane.xlu0 %787 }
 0x15b   :  { %v912_v0 = vmul.f32 0.00033772373, %v788_v61 }
 0x15d   :  { %v886_v5 = vpop.xlane.xlu1 %885  ;;  %v916_v8 = vmul.f32 %v912_v0, %v912_v0 }
 0x15e   :  { %v914_v9 = vmul.f32 0.00033772373, %v886_v5  ;;  %v920_v5 = vld [vmem:[%s1993_s2] sm:$0xff] }
 0x160   :  { %v918_v15 = vsub.f32 %v914_v9, %v916_v8 }
 0x162   :  { %v922_v16 = vadd.f32 1e-05, %v918_v15  ;;  %v813_v20 = vpop.xlane.xlu0 %812 }
 0x163   :  { %v913_v25 = vmul.f32 0.00033772373, %v813_v20 }
 0x164   :  { %1263 = vrsqrt.f32 %v922_v16  ;;  %vm930_vm3 = vweird.f32 %v922_v16 }
 0x165   :  { %v911_v29 = vpop.xlane.xlu1 %910  ;;  %v917_v22 = vmul.f32 %v913_v25, %v913_v25 }
 0x166   :  { %v915_v26 = vmul.f32 0.00033772373, %v911_v29  ;;  %v946_v29 = vld [vmem:[%s1994_s3] sm:$0xff] }
 0x168   :  { %v919_v46 = vsub.f32 %v915_v26, %v917_v22 }
 0x16a   :  { %v1264_v34 = vpop.eup %1263  ;;  %v923_v45 = vadd.f32 1e-05, %v919_v46 }
 0x16b   :  { %v925_v53 = vmul.f32 %v1264_v34, %v922_v16  ;;  %vm931_vm2 = vweird.f32 %v1264_v34 }
 0x16c   :  { %1265 = vrsqrt.f32 %v923_v45  ;;  %vm932_vm4 = vmor %vm930_vm3, %vm931_vm2  ;;  %vm940_vm6 = vweird.f32 %v923_v45 }
 0x16d   :  { %v926_v32 = vmul.f32 %v1264_v34, %v925_v53  ;;  %v947_v53 = vld [vmem:[%s1994_s3 + $0x8] sm:$0xff] }
 0x16f   :  { %v927_v55 = vmul.f32 0.5, %v926_v32 }
 0x171   :  { %v928_v3 = vsub.f32 1.5, %v927_v55 }
 0x172   :  { %v1266_v61 = vpop.eup %1265 }
 0x173   :  { %v935_v48 = vmul.f32 %v1266_v61, %v923_v45  ;;  %v929_v8 = vmul.f32 %v1264_v34, %v928_v3  ;;  %vm941_vm5 = vweird.f32 %v1266_v61  ;;  %v921_v3 = vld [vmem:[%s1993_s2 + $0x8] sm:$0xff]  ;;  %s1419_s2 = smov [#allocation5]  }
 0x174   :  { %vm942_vm7 = vmor %vm940_vm6, %vm941_vm5  ;;  %s1168_s3 = sshll.u32 %s1419_s2, 4  ;;  %s1169_s3 = int_to_ptr.vmem [resolvable:$true] %s1168_s3 }
 0x175   :  { %v936_v9 = vmul.f32 %v1266_v61, %v935_v48  ;;  %v933_v15 = vsel %vm932_vm4, %v1264_v34, %v929_v8 }
 0x176   :  { %v944_v22 = vmul.f32 %v933_v15, %v920_v5 }
 0x177   :  { %v937_v20 = vmul.f32 0.5, %v936_v9 }
 0x178   :  { %954 = vperm.xlu2 %1260, %v944_v22   ;;  %v948_v32 = vmul.f32 %v944_v22, %v912_v0 }
 0x179   :  { %v938_v26 = vsub.f32 1.5, %v937_v20 }
 0x17a   :  { %v950_v46 = vsub.f32 %v946_v29, %v948_v32 }
 0x17b   :  { %v939_v16 = vmul.f32 %v1266_v61, %v938_v26 }
 0x17c   :  { %1012 = vperm.xlu0 %1261, %v950_v46  }
 0x17d   :  { %v943_v48 = vsel %vm942_vm7, %v1266_v61, %v939_v16 }
 0x17e   :  { %v945_v34 = vmul.f32 %v943_v48, %v921_v3 }
 0x180   :  { %959 = vperm.xlu2 %1260, %v945_v34   ;;  %v949_v55 = vmul.f32 %v945_v34, %v913_v25 }
 0x182   :  { %v951_v0 = vsub.f32 %v947_v53, %v949_v55 }
 0x184   :  { %1017 = vperm.xlu1 %1262, %v951_v0  }
 0x1d2   :  { %v1833_v5 = vpop.permute.xlu2 %954 }
 0x1d3   :  { %v962_v8 = vmul.f32 %v1833_v5, %v1581_v36  ;;  %v963_v9 = vmul.f32 %v1833_v5, %v1583_v37  ;;  %v964_v61 = vmul.f32 %v1833_v5, %v1585_v38  ;;  %v965_v25 = vmul.f32 %v1833_v5, %v1589_v14 }
 0x1d4   :  { %v966_v20 = vmul.f32 %v1833_v5, %v1595_v42  ;;  %v967_v36 = vmul.f32 %v1833_v5, %v1599_v44  ;;  %v968_v38 = vmul.f32 %v1833_v5, %v1601_v27  ;;  %v969_v14 = vmul.f32 %v1833_v5, %v1613_v50 }
 0x1d5   :  { %v970_v42 = vmul.f32 %v1833_v5, %v1631_v62  ;;  %v971_v44 = vmul.f32 %v1833_v5, %v1639_v4  ;;  %v972_v3 = vmul.f32 %v1833_v5, %v1649_v13  ;;  %v973_v16 = vmul.f32 %v1833_v5, %v1659_v23 }
 0x1d6   :  { %v974_v34 = vmul.f32 %v1833_v5, %v1677_v49  ;;  %v975_v13 = vmul.f32 %v1833_v5, %v1687_v59  ;;  %v976_v23 = vmul.f32 %v1833_v5, %v1695_v6 }
 0x1ee   :  { %v1835_v45 = vpop.permute.xlu0 %1012 }
 0x1ef   :  { %v1020_v15 = vadd.f32 %v1835_v45, %v962_v8  ;;  %v1021_v22 = vadd.f32 %v1835_v45, %v963_v9  ;;  %v1022_v29 = vadd.f32 %v1835_v45, %v964_v61  ;;  %v1023_v37 = vadd.f32 %v1835_v45, %v965_v25 }
 0x1f0   :  { %v1024_v32 = vadd.f32 %v1835_v45, %v966_v20  ;;  %v1025_v26 = vadd.f32 %v1835_v45, %v967_v36  ;;  %v1026_v46 = vadd.f32 %v1835_v45, %v968_v38  ;;  %v1027_v27 = vadd.f32 %v1835_v45, %v969_v14 }
 0x1f1   :  { %1267 = vtanh.f32 %v1020_v15  ;;  %v1028_v50 = vadd.f32 %v1835_v45, %v970_v42  ;;  %v1029_v62 = vadd.f32 %v1835_v45, %v971_v44  ;;  %v1030_v4 = vadd.f32 %v1835_v45, %v972_v3 }
 0x1f2   :  { %1269 = vtanh.f32 %v1021_v22  ;;  %v1031_v55 = vadd.f32 %v1835_v45, %v973_v16  ;;  %v1032_v8 = vadd.f32 %v1835_v45, %v974_v34  ;;  %v977_v9 = vmul.f32 %v1833_v5, %v1708_v18 }
 0x1f3   :  { %1271 = vtanh.f32 %v1022_v29  ;;  %v1033_v61 = vadd.f32 %v1835_v45, %v975_v13  ;;  %v978_v15 = vmul.f32 %v1833_v5, %v1727_v52  ;;  %v1034_v25 = vadd.f32 %v1835_v45, %v976_v23 }
 0x1f4   :  { %1273 = vtanh.f32 %v1023_v37  ;;  %v979_v22 = vmul.f32 %v1833_v5, %v1733_v60  ;;  %v1035_v20 = vadd.f32 %v1835_v45, %v977_v9  ;;  %v980_v29 = vmul.f32 %v1833_v5, %v1745_v10 }
 0x1f5   :  { %1275 = vtanh.f32 %v1024_v32  ;;  %v1036_v36 = vadd.f32 %v1835_v45, %v978_v15  ;;  %v981_v37 = vmul.f32 %v1833_v5, %v1756_v28  ;;  %v982_v32 = vmul.f32 %v1833_v5, %v1773_v1 }
 0x1f6   :  { %1277 = vtanh.f32 %v1025_v26  ;;  %v1037_v38 = vadd.f32 %v1835_v45, %v979_v22  ;;  %v1038_v14 = vadd.f32 %v1835_v45, %v980_v29  ;;  %v1898_v26 = vpop.permute.xlu2 %959  ;;  %v983_v42 = vmul.f32 %v1833_v5, %v1782_v11  ;;  %v1909_v11 = vpop.permute.xlu1 %1017 }
 0x1f7   :  { %v1268_v48 = vpop.eup %1267  ;;  %1279 = vtanh.f32 %v1026_v46  ;;  %v1039_v28 = vadd.f32 %v1835_v45, %v981_v37  ;;  %v984_v44 = vmul.f32 %v1833_v5, %v1790_v31  ;;  %v1040_v1 = vadd.f32 %v1835_v45, %v982_v32 }
 0x1f8   :  { %v1270_v53 = vpop.eup %1269  ;;  %1281 = vtanh.f32 %v1027_v27  ;;  %1116 = vst [vmem:[#allocation5] sm:$0xff] %v1268_v48  ;;  %v985_v3 = vmul.f32 %v1833_v5, %v1801_v63  ;;  %v987_v34 = vmul.f32 %v1898_v26, %v1591_v40  ;;  %v989_v13 = vmul.f32 %v1898_v26, %v1597_v43 }
 0x1f9   :  { %v1272_v0 = vpop.eup %1271  ;;  %1283 = vtanh.f32 %v1028_v50  ;;  %1117 = vst [vmem:[#allocation5 + $0x8] sm:$0xff] %v1270_v53  ;;  %v1041_v50 = vadd.f32 %v1835_v45, %v983_v42  ;;  %v1042_v31 = vadd.f32 %v1835_v45, %v984_v44  ;;  %v991_v23 = vmul.f32 %v1898_v26, %v1615_v51 }
 0x1fa   :  { %v1274_v49 = vpop.eup %1273  ;;  %1285 = vtanh.f32 %v1029_v62  ;;  %1118 = vst [vmem:[#allocation5 + $0x10] sm:$0xff] %v1272_v0  ;;  %v986_v62 = vmul.f32 %v1898_v26, %v1587_v39  ;;  %v1043_v63 = vadd.f32 %v1835_v45, %v985_v3  ;;  %v1045_v40 = vadd.f32 %v1909_v11, %v987_v34  ;;  %v2005_v34 = vld [vmem:[#allocation9_spill] sm:$0xff] }
 0x1fb   :  { %v1276_v59 = vpop.eup %1275  ;;  %1287 = vtanh.f32 %v1030_v4  ;;  %1119 = vst [vmem:[#allocation5 + $0x18] sm:$0xff] %v1274_v49  ;;  %v988_v4 = vmul.f32 %v1898_v26, %v1593_v41  ;;  %v990_v45 = vmul.f32 %v1898_v26, %v1607_v47  ;;  %v1047_v43 = vadd.f32 %v1909_v11, %v989_v13 }
 0x1fc   :  { %v1278_v6 = vpop.eup %1277  ;;  %1289 = vtanh.f32 %v1031_v55  ;;  %1120 = vst [vmem:[#allocation5 + $0x20] sm:$0xff] %v1276_v59  ;;  %v1044_v39 = vadd.f32 %v1909_v11, %v986_v62  ;;  %v992_v49 = vmul.f32 %v1898_v26, %v1620_v56  ;;  %v1049_v59 = vadd.f32 %v1909_v11, %v991_v23  ;;  %v2004_v62 = vld [vmem:[#allocation8_spill] sm:$0xff] }
 0x1fd   :  { %v1280_v18 = vpop.eup %1279  ;;  %1291 = vtanh.f32 %v1032_v8  ;;  %1121 = vst [vmem:[#allocation5 + $0x28] sm:$0xff] %v1278_v6  ;;  %v1046_v41 = vadd.f32 %v1909_v11, %v988_v4  ;;  %v1048_v9 = vadd.f32 %v1909_v11, %v990_v45  ;;  %v994_v15 = vmul.f32 %v1898_v26, %v1655_v19  ;;  %v2006_v4 = vld [vmem:[#allocation10_spill] sm:$0xff] }
 0x1fe   :  { %v1282_v52 = vpop.eup %1281  ;;  %1293 = vtanh.f32 %v1033_v61  ;;  %1122 = vst [vmem:[#allocation5 + $0x30] sm:$0xff] %v1280_v18  ;;  %v993_v61 = vmul.f32 %v1898_v26, %v1636_v2  ;;  %v995_v6 = vmul.f32 %v1898_v26, %v1661_v24  ;;  %v997_v29 = vmul.f32 %v1898_v26, %v1684_v57 }
 0x1ff   :  { %v1284_v60 = vpop.eup %1283  ;;  %1295 = vtanh.f32 %v1034_v25  ;;  %1123 = vst [vmem:[#allocation5 + $0x38] sm:$0xff] %v1282_v52  ;;  %v1050_v25 = vadd.f32 %v1909_v11, %v992_v49  ;;  %v1052_v18 = vadd.f32 %v1909_v11, %v994_v15  ;;  %v998_v52 = vmul.f32 %v1898_v26, %v1703_v12 }
 0x200   :  { %v1286_v10 = vpop.eup %1285  ;;  %1297 = vtanh.f32 %v1035_v20  ;;  %1124 = vst [vmem:[#allocation5 + $0x40] sm:$0xff] %v1284_v60  ;;  %v1051_v22 = vadd.f32 %v1909_v11, %v993_v61  ;;  %v996_v20 = vmul.f32 %v1898_v26, %v1673_v35  ;;  %v1055_v60 = vadd.f32 %v1909_v11, %v997_v29 }
 0x201   :  { %v1288_v46 = vpop.eup %1287  ;;  %1299 = vtanh.f32 %v1036_v36  ;;  %1125 = vst [vmem:[#allocation5 + $0x48] sm:$0xff] %v1286_v10  ;;  %v1053_v36 = vadd.f32 %v1909_v11, %v995_v6  ;;  %v1000_v32 = vmul.f32 %v1898_v26, %v1721_v33  ;;  %v1001_v10 = vmul.f32 %v1898_v26, %v1731_v58 }
 0x202   :  { %v1290_v27 = vpop.eup %1289  ;;  %1301 = vtanh.f32 %v1037_v38  ;;  %1126 = vst [vmem:[#allocation5 + $0x50] sm:$0xff] %v1288_v46  ;;  %v1054_v37 = vadd.f32 %v1909_v11, %v996_v20  ;;  %v999_v38 = vmul.f32 %v1898_v26, %v1711_v21  ;;  %v1003_v44 = vmul.f32 %v1898_v26, %v1759_v30 }
 0x203   :  { %v1292_v16 = vpop.eup %1291  ;;  %1303 = vtanh.f32 %v1038_v14  ;;  %1127 = vst [vmem:[#allocation5 + $0x58] sm:$0xff] %v1290_v27  ;;  %v1056_v14 = vadd.f32 %v1909_v11, %v998_v52  ;;  %v1058_v46 = vadd.f32 %v1909_v11, %v1000_v32  ;;  %v1004_v27 = vmul.f32 %v1898_v26, %v1767_v54 }
 0x204   :  { %v1294_v48 = vpop.eup %1293  ;;  %1305 = vtanh.f32 %v1039_v28  ;;  %1128 = vst [vmem:[#allocation5 + $0x60] sm:$0xff] %v1292_v16  ;;  %v1057_v42 = vadd.f32 %v1909_v11, %v999_v38  ;;  %v1002_v28 = vmul.f32 %v1898_v26, %v1749_v17  ;;  %v1061_v16 = vadd.f32 %v1909_v11, %v1003_v44 }
 0x205   :  { %v1296_v5 = vpop.eup %1295  ;;  %1307 = vtanh.f32 %v1040_v1  ;;  %1129 = vst [vmem:[#allocation5 + $0x68] sm:$0xff] %v1294_v48  ;;  %v1059_v1 = vadd.f32 %v1909_v11, %v1001_v10  ;;  %v1062_v48 = vadd.f32 %v1909_v11, %v1004_v27 }
 0x206   :  { %v1298_v53 = vpop.eup %1297  ;;  %1309 = vtanh.f32 %v1041_v50  ;;  %1130 = vst [vmem:[#allocation5 + $0x70] sm:$0xff] %v1296_v5  ;;  %v1060_v3 = vadd.f32 %v1909_v11, %v1002_v28  ;;  %v1005_v50 = vmul.f32 %v1898_v26, %v1777_v7 }
 0x207   :  { %v1300_v55 = vpop.eup %1299  ;;  %1311 = vtanh.f32 %v1042_v31  ;;  %1131 = vst [vmem:[#allocation5 + $0x78] sm:$0xff] %v1298_v53  ;;  %v1006_v31 = vmul.f32 %v1898_v26, %v2004_v62 }
 0x208   :  { %v1302_v0 = vpop.eup %1301  ;;  %1313 = vtanh.f32 %v1043_v63  ;;  %1132 = vst [vmem:[#allocation5 + $0x80] sm:$0xff] %v1300_v55  ;;  %v1007_v63 = vmul.f32 %v1898_v26, %v2005_v34  ;;  %v1063_v5 = vadd.f32 %v1909_v11, %v1005_v50 }
 0x209   :  { %v1304_v8 = vpop.eup %1303  ;;  %1133 = vst [vmem:[#allocation5 + $0x88] sm:$0xff] %v1302_v0  ;;  %1315 = vtanh.f32 %v1044_v39  ;;  %v1008_v39 = vmul.f32 %v1898_v26, %v2006_v4  ;;  %v1064_v53 = vadd.f32 %v1909_v11, %v1006_v31 }
 0x20a   :  { %v1306_v47 = vpop.eup %1305  ;;  %1134 = vst [vmem:[#allocation5 + $0x90] sm:$0xff] %v1304_v8  ;;  %1317 = vtanh.f32 %v1045_v40  ;;  %v2007_v40 = vld [vmem:[#allocation11_spill] sm:$0xff]  ;;  %v1065_v45 = vadd.f32 %v1909_v11, %v1007_v63 }
 0x20b   :  { %v1308_v51 = vpop.eup %1307  ;;  %1135 = vst [vmem:[#allocation5 + $0x98] sm:$0xff] %v1306_v47  ;;  %1319 = vtanh.f32 %v1046_v41  ;;  %v1009_v55 = vmul.f32 %v1898_v26, %v2007_v40  ;;  %v1066_v0 = vadd.f32 %v1909_v11, %v1008_v39 }
 0x20c   :  { %v1310_v56 = vpop.eup %1309  ;;  %1136 = vst [vmem:[#allocation5 + $0xa0] sm:$0xff] %v1308_v51  ;;  %1321 = vtanh.f32 %v1047_v43 }
 0x20d   :  { %v1312_v2 = vpop.eup %1311  ;;  %1137 = vst [vmem:[#allocation5 + $0xa8] sm:$0xff] %v1310_v56  ;;  %1323 = vtanh.f32 %v1048_v9  ;;  %v1067_v43 = vadd.f32 %v1909_v11, %v1009_v55 }
 0x20e   :  { %v1314_v19 = vpop.eup %1313  ;;  %1138 = vst [vmem:[#allocation5 + $0xb0] sm:$0xff] %v1312_v2  ;;  %1325 = vtanh.f32 %v1049_v59 }
 0x20f   :  { %v1316_v24 = vpop.eup %1315  ;;  %1139 = vst [vmem:[#allocation5 + $0xb8] sm:$0xff] %v1314_v19  ;;  %1327 = vtanh.f32 %v1050_v25 }
 0x210   :  { %v1318_v35 = vpop.eup %1317  ;;  %1329 = vtanh.f32 %v1051_v22  ;;  %1140 = vst [vmem:[#allocation5 + $0xc0] sm:$0xff] %v1316_v24 }
 0x211   :  { %v1320_v57 = vpop.eup %1319  ;;  %1331 = vtanh.f32 %v1052_v18  ;;  %1141 = vst [vmem:[#allocation5 + $0xc8] sm:$0xff] %v1318_v35 }
 0x212   :  { %v1322_v12 = vpop.eup %1321  ;;  %1333 = vtanh.f32 %v1053_v36  ;;  %1142 = vst [vmem:[#allocation5 + $0xd0] sm:$0xff] %v1320_v57 }
 0x213   :  { %v1324_v21 = vpop.eup %1323  ;;  %1335 = vtanh.f32 %v1054_v37  ;;  %1143 = vst [vmem:[#allocation5 + $0xd8] sm:$0xff] %v1322_v12 }
 0x214   :  { %v1326_v33 = vpop.eup %1325  ;;  %1337 = vtanh.f32 %v1055_v60  ;;  %1144 = vst [vmem:[#allocation5 + $0xe0] sm:$0xff] %v1324_v21 }
 0x215   :  { %v1328_v58 = vpop.eup %1327  ;;  %1339 = vtanh.f32 %v1056_v14  ;;  %1145 = vst [vmem:[#allocation5 + $0xe8] sm:$0xff] %v1326_v33 }
 0x216   :  { %v1330_v17 = vpop.eup %1329  ;;  %1341 = vtanh.f32 %v1057_v42  ;;  %1146 = vst [vmem:[#allocation5 + $0xf0] sm:$0xff] %v1328_v58 }
 0x217   :  { %v1332_v30 = vpop.eup %1331  ;;  %1343 = vtanh.f32 %v1058_v46  ;;  %1147 = vst [vmem:[#allocation5 + $0xf8] sm:$0xff] %v1330_v17 }
 0x218   :  { %v1334_v54 = vpop.eup %1333  ;;  %1345 = vtanh.f32 %v1059_v1  ;;  %1148 = vst [vmem:[#allocation5 + $0x100] sm:$0xff] %v1332_v30 }
 0x219   :  { %v1336_v7 = vpop.eup %1335  ;;  %1347 = vtanh.f32 %v1060_v3  ;;  %1149 = vst [vmem:[#allocation5 + $0x108] sm:$0xff] %v1334_v54 }
 0x21a   :  { %v1338_v13 = vpop.eup %1337  ;;  %1349 = vtanh.f32 %v1061_v16  ;;  %1150 = vst [vmem:[#allocation5 + $0x110] sm:$0xff] %v1336_v7 }
 0x21b   :  { %v1340_v41 = vpop.eup %1339  ;;  %1351 = vtanh.f32 %v1062_v48  ;;  %1151 = vst [vmem:[#allocation5 + $0x118] sm:$0xff] %v1338_v13 }
 0x21c   :  { %v1342_v23 = vpop.eup %1341  ;;  %1353 = vtanh.f32 %v1063_v5  ;;  %1152 = vst [vmem:[#allocation5 + $0x120] sm:$0xff] %v1340_v41 }
 0x21d   :  { %v1344_v8 = vpop.eup %1343  ;;  %1355 = vtanh.f32 %v1064_v53  ;;  %1153 = vst [vmem:[#allocation5 + $0x128] sm:$0xff] %v1342_v23 }
 0x21e   :  { %v1346_v49 = vpop.eup %1345  ;;  %1357 = vtanh.f32 %v1065_v45  ;;  %1154 = vst [vmem:[#allocation5 + $0x130] sm:$0xff] %v1344_v8 }
 0x21f   :  { %v1348_v26 = vpop.eup %1347  ;;  %1359 = vtanh.f32 %v1066_v0  ;;  %1155 = vst [vmem:[#allocation5 + $0x138] sm:$0xff] %v1346_v49 }
 0x220   :  { %v1350_v9 = vpop.eup %1349  ;;  %1361 = vtanh.f32 %v1067_v43  ;;  %1156 = vst [vmem:[#allocation5 + $0x140] sm:$0xff] %v1348_v26 }
 0x221   :  { %v1352_v47 = vpop.eup %1351  ;;  %1157 = vst [vmem:[#allocation5 + $0x148] sm:$0xff] %v1350_v9 }
 0x222   :  { %v1354_v61 = vpop.eup %1353  ;;  %1158 = vst [vmem:[#allocation5 + $0x150] sm:$0xff] %v1352_v47 }
 0x223   :  { %v1356_v11 = vpop.eup %1355  ;;  %1159 = vst [vmem:[#allocation5 + $0x158] sm:$0xff] %v1354_v61 }
 0x224   :  { %v1358_v59 = vpop.eup %1357  ;;  %1160 = vst [vmem:[#allocation5 + $0x160] sm:$0xff] %v1356_v11 }
 0x225   :  { %v1360_v51 = vpop.eup %1359  ;;  %1161 = vst [vmem:[#allocation5 + $0x168] sm:$0xff] %v1358_v59 }
 0x226   :  { %v1362_v15 = vpop.eup %1361  ;;  %1162 = vst [vmem:[#allocation5 + $0x170] sm:$0xff] %v1360_v51 }
 0x227   :  { %1163 = vst [vmem:[#allocation5 + $0x178] sm:$0xff] %v1362_v15 }
 0x228   :  { %1176 = dma.vmem_to_hbm [thread:$0]  %s1169_s3, 6144, %s1171_s8, [#allocation4], %s1416_s20, %s1416_s20, %s1417_s21  }
 0x229   :  { %1413 = dma.done.wait [#allocation4], 6144  }
 0x22a   :  { %1414 = vsyncadd [#allocation4], 4294961152 }
 0x22b   :  { %1181 = vsyncpa [#allocation3], 1 }
 0x22c   :  { %1182 = vsyncpa [#allocation4], 1 }

</bundles_post_ra>
